<compile_context>
chip_gen: v7x
topology: tpu7x:2x2x1
jax: 0.10.0
libtpu: 0.0.40
codegen_flags: <defaults>
</compile_context>

<pallas_src>
import jax
import jax.numpy as jnp
from jax.experimental import pallas as pl
from jax.experimental.pallas import tpu as pltpu


def _round_up(x, m):
    return ((x + m - 1) // m) * m


def _make_actor_kernel(action_size):
    def actor_kernel(x_ref, w1_ref, b1_ref, w2_ref, b2_ref, w3_ref, b3_ref, out_ref):
        # Layer 1: Linear(state_size -> 128) + ReLU (bf16 MXU operands, f32 acc).
        # .astype is a no-op if the caller already feeds bf16 state.
        x = x_ref[...].astype(jnp.bfloat16)
        h1 = jnp.dot(x, w1_ref[...], preferred_element_type=jnp.float32) + b1_ref[...]
        h1 = jnp.maximum(h1, 0.0).astype(jnp.bfloat16)
        # Layer 2: Linear(128 -> 256) + ReLU
        h2 = jnp.dot(h1, w2_ref[...], preferred_element_type=jnp.float32) + b2_ref[...]
        h2 = jnp.maximum(h2, 0.0).astype(jnp.bfloat16)
        # Layer 3: Linear(256 -> A_pad) — lane-dense; padded columns are zero.
        logits = jnp.dot(h2, w3_ref[...], preferred_element_type=jnp.float32) + b3_ref[...]
        # Mask padded action lanes out of the softmax.
        lane = jax.lax.broadcasted_iota(jnp.int32, logits.shape, 1)
        logits = jnp.where(lane < action_size, logits, -jnp.inf)
        # Numerically-stable softmax with an EXACT divide (rows sum to 1
        # within f32 eps; approx reciprocal was the previous failure).
        m = jnp.max(logits, axis=-1, keepdims=True)
        e = jnp.exp(logits - m)
        denom = jnp.sum(e, axis=-1, keepdims=True)
        probs = e / denom
        out_ref[...] = probs.astype(out_ref.dtype)

    return actor_kernel


def actor_forward(state, params, out_dtype=jnp.float32):
    """state: (B, state_size) f32 or bf16; params: dict (bf16 weights, f32 biases).

    Jit this together with the consumer so the de-padding slice fuses with the
    pallas_call output instead of making a second HBM pass.
    """
    w1, b1 = params["w1"], params["b1"]
    w2, b2 = params["w2"], params["b2"]
    w3, b3 = params["w3"], params["b3"]

    B, S = state.shape
    H1 = w1.shape[1]            # 128
    H2 = w2.shape[1]            # 256
    A = w3.shape[1]             # action_size

    # Lane-dense final layer: pad the action dim up to a multiple of 128.
    A_pad = _round_up(A, 128)
    if A_pad != A:
        w3p = jnp.pad(w3, ((0, 0), (0, A_pad - A)))
        b3p = jnp.pad(b3, ((0, 0), (0, A_pad - A)))
    else:
        w3p, b3p = w3, b3

    # Batch tiling.
    #  * small batches (single env step / tiny rollout): one tile, rounded up
    #    to 16 rows so bf16 MXU-feed vregs are fully packed (16 sublanes/vreg).
    #  * large rollout batches: 256-512-row tiles amortize the ~0.35 us
    #    per-grid-step overhead, while keeping >= 2 grid steps so v7x's second
    #    TensorCore gets work via dimension_semantics=("parallel",).
    if B < 128:
        TB = _round_up(max(B, 1), 16)
    else:
        TB = min(512, max(128, _round_up(pl.cdiv(B, 2), 128)))
    Bp = _round_up(B, TB)
    xp = state if Bp == B else jnp.pad(state, ((0, Bp - B), (0, 0)))

    kernel = _make_actor_kernel(A)

    out_itemsize = jnp.dtype(out_dtype).itemsize
    flops = 2 * Bp * (S * H1 + H1 * H2 + H2 * A_pad)
    bytes_accessed = (
        xp.size * xp.dtype.itemsize
        + sum(int(p.size) * p.dtype.itemsize for p in (w1, b1, w2, b2, w3p, b3p))
        + Bp * A_pad * out_itemsize
    )
    cost = pl.CostEstimate(flops=flops, transcendentals=Bp * A_pad,
                           bytes_accessed=bytes_accessed)

    # Weights/biases: same block index every grid step -> DMA'd once (revisit
    # caching) and VMEM-resident for the whole grid.
    resident = lambda shape: pl.BlockSpec(shape, lambda i: (0, 0))

    out = pl.pallas_call(
        kernel,
        out_shape=jax.ShapeDtypeStruct((Bp, A_pad), out_dtype),
        grid=(Bp // TB,),
        in_specs=[
            pl.BlockSpec((TB, S), lambda i: (i, 0)),       # state tile (pipelined)
            resident(w1.shape), resident(b1.shape),
            resident(w2.shape), resident(b2.shape),
            resident(w3p.shape), resident(b3p.shape),
        ],
        out_specs=pl.BlockSpec((TB, A_pad), lambda i: (i, 0)),
        compiler_params=pltpu.CompilerParams(
            dimension_semantics=("parallel",)),            # megacore on v7x
        cost_estimate=cost,
    )(xp, w1, b1, w2, b2, w3p, b3p)

    # Strip batch padding and the lane padding of the action dimension.
    return out[:B, :A]


def actor_reference(state, params):
    """Pure-JAX reference with the same bf16-operand / f32-accumulate math."""
    x = state.astype(jnp.bfloat16)
    h1 = jnp.maximum(
        jnp.dot(x, params["w1"], preferred_element_type=jnp.float32) + params["b1"], 0.0
    ).astype(jnp.bfloat16)
    h2 = jnp.maximum(
        jnp.dot(h1, params["w2"], preferred_element_type=jnp.float32) + params["b2"], 0.0
    ).astype(jnp.bfloat16)
    logits = jnp.dot(h2, params["w3"], preferred_element_type=jnp.float32) + params["b3"]
    return jax.nn.softmax(logits, axis=-1)


def init_params(key, state_size, action_size):
    """Deterministic synthetic init (uniform, torch-Linear-like fan_in scaling).

    Weights are stored transposed as (in, out) and in bf16 for the MXU;
    biases stay f32 (bias-add / softmax run in f32 on the VPU).
    """
    ks = jax.random.split(key, 6)

    def lin(kw, kb, fan_in, fan_out):
        bound = 1.0 / jnp.sqrt(float(fan_in))
        w = jax.random.uniform(kw, (fan_in, fan_out), jnp.float32, -bound, bound)
        b = jax.random.uniform(kb, (1, fan_out), jnp.float32, -bound, bound)
        return w.astype(jnp.bfloat16), b

    w1, b1 = lin(ks[0], ks[1], state_size, 128)
    w2, b2 = lin(ks[2], ks[3], 128, 256)
    w3, b3 = lin(ks[4], ks[5], 256, action_size)
    return {"w1": w1, "b1": b1, "w2": w2, "b2": b2, "w3": w3, "b3": b3}


if __name__ == "__main__":
    key = jax.random.PRNGKey(0)
    k_params, k_state = jax.random.split(key)

    state_size, action_size, batch = 32, 8, 8
    params = init_params(k_params, state_size, action_size)
    state = jax.random.normal(k_state, (batch, state_size), dtype=jnp.float32)

    # Jit the whole wrapper so the de-pad slice fuses with the pallas_call.
    fwd = jax.jit(actor_forward, static_argnames=("out_dtype",))

    probs = jax.block_until_ready(fwd(state, params))

    # sanity: shape, exact softmax rows sum to 1, and parity with a pure-JAX
    # reference of the same bf16-operand / f32-accumulate math.
    assert probs.shape == (batch, action_size)
    assert probs.dtype == jnp.float32
    row_sums = jnp.sum(probs, axis=-1)
    assert bool(jnp.all(jnp.abs(row_sums - 1.0) < 1e-3))
    ref = jax.block_until_ready(actor_reference(state, params))
    assert bool(jnp.all(jnp.abs(probs - ref) < 1e-2))

    # bf16 output path (for downstream consumers that accept bf16 probs):
    # halves vst / HBM writeback traffic on the padded (Bp, 128) slab.
    probs_bf16 = jax.block_until_ready(fwd(state, params, out_dtype=jnp.bfloat16))
    assert probs_bf16.shape == (batch, action_size)
    assert probs_bf16.dtype == jnp.bfloat16
    bf16_row_sums = jnp.sum(probs_bf16.astype(jnp.float32), axis=-1)
    assert bool(jnp.all(jnp.abs(bf16_row_sums - 1.0) < 1e-2))

    print("KERNEL_OK")
</pallas_src>

<mosaic_0001>
module attributes {stable_mosaic.version = 11 : i64} {
  func.func @actor_kernel(%arg0: i32, %arg1: memref<16x32xf32, #tpu.memory_space<vmem>>, %arg2: memref<32x128xbf16, #tpu.memory_space<vmem>>, %arg3: memref<1x128xf32, #tpu.memory_space<vmem>>, %arg4: memref<128x256xbf16, #tpu.memory_space<vmem>>, %arg5: memref<1x256xf32, #tpu.memory_space<vmem>>, %arg6: memref<256x128xbf16, #tpu.memory_space<vmem>>, %arg7: memref<1x128xf32, #tpu.memory_space<vmem>>, %arg8: memref<16x128xf32, #tpu.memory_space<vmem>>) attributes {dimension_semantics = [#tpu.dimension_semantics<parallel>], iteration_bounds = array<i64: 1>, scalar_prefetch = 0 : i64, scratch_operands = 0 : i64, tpu.core_type = #tpu.core_type<tc>, window_params = [{transform_indices = @transform_0, window_bounds = array<i64: 16, 32>}, {pipeline_mode = #tpu.pipeline_mode<synchronous>, transform_indices = @transform_1, window_bounds = array<i64: 32, 128>}, {pipeline_mode = #tpu.pipeline_mode<synchronous>, transform_indices = @transform_2, window_bounds = array<i64: 1, 128>}, {pipeline_mode = #tpu.pipeline_mode<synchronous>, transform_indices = @transform_3, window_bounds = array<i64: 128, 256>}, {pipeline_mode = #tpu.pipeline_mode<synchronous>, transform_indices = @transform_4, window_bounds = array<i64: 1, 256>}, {pipeline_mode = #tpu.pipeline_mode<synchronous>, transform_indices = @transform_5, window_bounds = array<i64: 256, 128>}, {pipeline_mode = #tpu.pipeline_mode<synchronous>, transform_indices = @transform_6, window_bounds = array<i64: 1, 128>}, {transform_indices = @transform_7, window_bounds = array<i64: 16, 128>}]} {
    %c0 = arith.constant 0 : index
    %c0_0 = arith.constant 0 : index
    %0 = vector.load %arg1[%c0, %c0_0] : memref<16x32xf32, #tpu.memory_space<vmem>>, vector<16x32xf32>
    %1 = arith.truncf %0 : vector<16x32xf32> to vector<16x32xbf16>
    %c0_1 = arith.constant 0 : index
    %c0_2 = arith.constant 0 : index
    %2 = vector.load %arg2[%c0_1, %c0_2] : memref<32x128xbf16, #tpu.memory_space<vmem>>, vector<32x128xbf16>
    %cst = arith.constant dense<0.000000e+00> : vector<16x128xf32>
    %3 = tpu.matmul %1, %2, %cst {dimension_numbers = #tpu.dot_dimension_numbers<[1], [0], [0], [1], [0, 0, 1, 1], [], []>} : vector<16x32xbf16>, vector<32x128xbf16>, vector<16x128xf32> -> vector<16x128xf32>
    %c0_3 = arith.constant 0 : index
    %c0_4 = arith.constant 0 : index
    %4 = vector.load %arg3[%c0_3, %c0_4] : memref<1x128xf32, #tpu.memory_space<vmem>>, vector<1x128xf32>
    %5 = vector.broadcast %4 : vector<1x128xf32> to vector<16x128xf32>
    %6 = arith.addf %3, %5 : vector<16x128xf32>
    %cst_5 = arith.constant 0.000000e+00 : f32
    %7 = vector.broadcast %cst_5 : f32 to vector<16x128xf32>
    %8 = arith.maximumf %6, %7 : vector<16x128xf32>
    %9 = arith.truncf %8 : vector<16x128xf32> to vector<16x128xbf16>
    %c0_6 = arith.constant 0 : index
    %c0_7 = arith.constant 0 : index
    %10 = vector.load %arg4[%c0_6, %c0_7] : memref<128x256xbf16, #tpu.memory_space<vmem>>, vector<128x256xbf16>
    %cst_8 = arith.constant dense<0.000000e+00> : vector<16x256xf32>
    %11 = tpu.matmul %9, %10, %cst_8 {dimension_numbers = #tpu.dot_dimension_numbers<[1], [0], [0], [1], [0, 0, 1, 1], [], []>} : vector<16x128xbf16>, vector<128x256xbf16>, vector<16x256xf32> -> vector<16x256xf32>
    %c0_9 = arith.constant 0 : index
    %c0_10 = arith.constant 0 : index
    %12 = vector.load %arg5[%c0_9, %c0_10] : memref<1x256xf32, #tpu.memory_space<vmem>>, vector<1x256xf32>
    %13 = vector.broadcast %12 : vector<1x256xf32> to vector<16x256xf32>
    %14 = arith.addf %11, %13 : vector<16x256xf32>
    %cst_11 = arith.constant 0.000000e+00 : f32
    %15 = vector.broadcast %cst_11 : f32 to vector<16x256xf32>
    %16 = arith.maximumf %14, %15 : vector<16x256xf32>
    %17 = arith.truncf %16 : vector<16x256xf32> to vector<16x256xbf16>
    %c0_12 = arith.constant 0 : index
    %c0_13 = arith.constant 0 : index
    %18 = vector.load %arg6[%c0_12, %c0_13] : memref<256x128xbf16, #tpu.memory_space<vmem>>, vector<256x128xbf16>
    %cst_14 = arith.constant dense<0.000000e+00> : vector<16x128xf32>
    %19 = tpu.matmul %17, %18, %cst_14 {dimension_numbers = #tpu.dot_dimension_numbers<[1], [0], [0], [1], [0, 0, 1, 1], [], []>} : vector<16x256xbf16>, vector<256x128xbf16>, vector<16x128xf32> -> vector<16x128xf32>
    %c0_15 = arith.constant 0 : index
    %c0_16 = arith.constant 0 : index
    %20 = vector.load %arg7[%c0_15, %c0_16] : memref<1x128xf32, #tpu.memory_space<vmem>>, vector<1x128xf32>
    %21 = vector.broadcast %20 : vector<1x128xf32> to vector<16x128xf32>
    %22 = arith.addf %19, %21 : vector<16x128xf32>
    %23 = tpu.iota {dimensions = array<i32: 1>} : vector<16x128xi32>
    %c8_i32 = arith.constant 8 : i32
    %24 = vector.broadcast %c8_i32 : i32 to vector<16x128xi32>
    %25 = arith.cmpi slt, %23, %24 : vector<16x128xi32>
    %cst_17 = arith.constant 0xFF800000 : f32
    %26 = vector.broadcast %cst_17 : f32 to vector<16x128xf32>
    %27 = arith.select %25, %22, %26 : vector<16x128xi1>, vector<16x128xf32>
    %cst_18 = arith.constant dense<0xFF800000> : vector<16xf32>
    %28 = vector.multi_reduction <maximumf>, %27, %cst_18 [1] : vector<16x128xf32> to vector<16xf32>
    %29 = vector.shape_cast %28 : vector<16xf32> to vector<16x1xf32>
    %30 = vector.broadcast %29 : vector<16x1xf32> to vector<16x128xf32>
    %31 = arith.subf %27, %30 : vector<16x128xf32>
    %32 = math.exp %31 : vector<16x128xf32>
    %cst_19 = arith.constant dense<0.000000e+00> : vector<16xf32>
    %33 = vector.multi_reduction <add>, %32, %cst_19 [1] : vector<16x128xf32> to vector<16xf32>
    %34 = vector.shape_cast %33 : vector<16xf32> to vector<16x1xf32>
    %35 = vector.broadcast %34 : vector<16x1xf32> to vector<16x128xf32>
    %36 = arith.divf %32, %35 : vector<16x128xf32>
    %c0_20 = arith.constant 0 : index
    %c0_21 = arith.constant 0 : index
    %37 = vector.load %arg8[%c0_20, %c0_21] : memref<16x128xf32, #tpu.memory_space<vmem>>, vector<16x128xf32>
    tpu.vector_store %arg8[%c0_20, %c0_21], %36 {strides = array<i32>} : memref<16x128xf32, #tpu.memory_space<vmem>>, vector<16x128xf32>,
    return
  }
  func.func @transform_0(%arg0: i32) -> (i32, i32) {
    %c0_i32 = arith.constant 0 : i32
    %c0_i32_0 = arith.constant 0 : i32
    return %arg0, %c0_i32 : i32, i32
  }
  func.func @transform_1(%arg0: i32) -> (i32, i32) {
    %c0_i32 = arith.constant 0 : i32
    %c0_i32_0 = arith.constant 0 : i32
    %c0_i32_1 = arith.constant 0 : i32
    return %c0_i32, %c0_i32_0 : i32, i32
  }
  func.func @transform_2(%arg0: i32) -> (i32, i32) {
    %c0_i32 = arith.constant 0 : i32
    %c0_i32_0 = arith.constant 0 : i32
    %c0_i32_1 = arith.constant 0 : i32
    return %c0_i32, %c0_i32_0 : i32, i32
  }
  func.func @transform_3(%arg0: i32) -> (i32, i32) {
    %c0_i32 = arith.constant 0 : i32
    %c0_i32_0 = arith.constant 0 : i32
    %c0_i32_1 = arith.constant 0 : i32
    return %c0_i32, %c0_i32_0 : i32, i32
  }
  func.func @transform_4(%arg0: i32) -> (i32, i32) {
    %c0_i32 = arith.constant 0 : i32
    %c0_i32_0 = arith.constant 0 : i32
    %c0_i32_1 = arith.constant 0 : i32
    return %c0_i32, %c0_i32_0 : i32, i32
  }
  func.func @transform_5(%arg0: i32) -> (i32, i32) {
    %c0_i32 = arith.constant 0 : i32
    %c0_i32_0 = arith.constant 0 : i32
    %c0_i32_1 = arith.constant 0 : i32
    return %c0_i32, %c0_i32_0 : i32, i32
  }
  func.func @transform_6(%arg0: i32) -> (i32, i32) {
    %c0_i32 = arith.constant 0 : i32
    %c0_i32_0 = arith.constant 0 : i32
    %c0_i32_1 = arith.constant 0 : i32
    return %c0_i32, %c0_i32_0 : i32, i32
  }
  func.func @transform_7(%arg0: i32) -> (i32, i32) {
    %c0_i32 = arith.constant 0 : i32
    %c0_i32_0 = arith.constant 0 : i32
    return %arg0, %c0_i32 : i32, i32
  }
}

</mosaic_0001>

<bundles_post_ra>
// kernel: actor_forward.1
= control target key start
LH: loop header
LB: loop body
LE: loop exit
PB: predicated region body
PF: predicated region fallthrough
CT: control target
= control target key end

     0   :  { %v586_v0 = vmov 0.0   ;;  %vm587_vm0 = vmmov 0   ;;  %vm53_vm1 = vcmask 261120   ;;  %v588_v22 = vmov 0   ;;  %s752_s1 = inlined_call_operand.vmem [shape: bf16[32,128], index: 1, kind: input, shape index: {}]   ;;  %s753_s0 = inlined_call_operand.vmem [shape: f32[16,32], index: 0, kind: input, shape index: {}]   ;;  %s754_s3 = inlined_call_operand.vmem [shape: bf16[128,256], index: 3, kind: input, shape index: {}]   ;;  %s755_s5 = inlined_call_operand.vmem [shape: bf16[256,128], index: 5, kind: input, shape index: {}]   ;;  %s756_s2 = inlined_call_operand.vmem [shape: f32[1,128], index: 2, kind: input, shape index: {}]   ;;  %s757_s4 = inlined_call_operand.vmem [shape: f32[1,256], index: 4, kind: input, shape index: {}]   ;;  %s758_s6 = inlined_call_operand.vmem [shape: f32[1,128], index: 6, kind: input, shape index: {}]   ;;  %s759_s7 = inlined_call_operand.vmem [shape: f32[16,128], index: 7, kind: output, shape index: {}]  }
   0x1   :  { %525 = vmatprep.subr.bf16.mxu0 %v586_v0  ;;  %v536_v1 = vld [vmem:[%s752_s1] sm:$0xff]   ;;  %529 = vmatprep.mubr.msk.bf16.mxu0 %vm587_vm0, %v586_v0  ;;  %v537_v2 = vld [vmem:[%s752_s1 + $0x8] sm:$0xff]   ;;  %v541_v7 = vld [vmem:[%s754_s3 + $0x14] ss:$8 sps:$4 sm:$0xff]   ;;  %v119_v49 = vlaneseq }
   0x2   :  { %526 = vmatpush3.bf16.msra.mxu0 %v536_v1  ;;  %v27_v3 = vld [vmem:[%s753_s0] sm:$0xff]  ;;  %v28_v4 = vld [vmem:[%s753_s0 + $0x8] sm:$0xff]  ;;  %v543_v9 = vld [vmem:[%s754_s3 + $0x10] ss:$8 sps:$4 sm:$0xff]   ;;  %241 = vmatprep.mubr.bf16.mxu1 %v588_v22 }
   0x3   :  { %527 = vmatprep.subr.bf16.mxu0 %v586_v0  ;;  %v538_v5 = vld [vmem:[%s754_s3 + $0x4] ss:$8 sps:$4 sm:$0xff]   ;;  %v540_v6 = vld [vmem:[%s754_s3] ss:$8 sps:$4 sm:$0xff]   ;;  %v29_v8 = vpack.c.bf16 %v28_v4, %v27_v3  ;;  %v547_v12 = vld [vmem:[%s754_s3 + $0x34] ss:$8 sps:$4 sm:$0xff]  }
   0x4   :  { %209 = vmatprep.subr.bf16.mxu1 %v538_v5  ;;  %v544_v10 = vld [vmem:[%s754_s3 + $0x24] ss:$8 sps:$4 sm:$0xff]   ;;  %v546_v11 = vld [vmem:[%s754_s3 + $0x20] ss:$8 sps:$4 sm:$0xff]   ;;  %v549_v13 = vld [vmem:[%s754_s3 + $0x30] ss:$8 sps:$4 sm:$0xff]  }
   0x5   :  { %210 = vmatpush1.bf16.msra.mxu1 %v540_v6  ;;  %v550_v14 = vld [vmem:[%s754_s3 + $0x44] ss:$8 sps:$4 sm:$0xff]   ;;  %v552_v15 = vld [vmem:[%s754_s3 + $0x40] ss:$8 sps:$4 sm:$0xff]   ;;  %v553_v16 = vld [vmem:[%s754_s3 + $0x54] ss:$8 sps:$4 sm:$0xff]  }
   0x6   :  { %528 = vmatpush3.bf16.msra.mxu0 %v537_v2  ;;  %211 = vmatprep.subr.bf16.mxu1 %v541_v7  ;;  %v555_v17 = vld [vmem:[%s754_s3 + $0x50] ss:$8 sps:$4 sm:$0xff]   ;;  %v556_v18 = vld [vmem:[%s754_s3 + $0x64] ss:$8 sps:$4 sm:$0xff]   ;;  %v558_v19 = vld [vmem:[%s754_s3 + $0x60] ss:$8 sps:$4 sm:$0xff]  }
   0x7   :  { %v559_v20 = vld [vmem:[%s754_s3 + $0x74] ss:$8 sps:$4 sm:$0xff]   ;;  %v561_v21 = vld [vmem:[%s754_s3 + $0x70] ss:$8 sps:$4 sm:$0xff]   ;;  %v562_v23 = vld [vmem:[%s755_s5 + $0x40] sm:$0xff]   ;;  %v120_v50 = vshrl.u32 %v119_v49, 7 }
   0x8   :  { %v563_v24 = vld [vmem:[%s755_s5] sm:$0xff]   ;;  %503 = vmatprep.subr.bf16.mxu0 %v562_v23  ;;  %v564_v25 = vld [vmem:[%s755_s5 + $0x48] sm:$0xff]   ;;  %v566_v27 = vld [vmem:[%s755_s5 + $0x50] sm:$0xff]   ;;  %v435_v6 = vand.u32 127, %v119_v49 }
   0x9   :  { %530 = vmatmul.mubr.msk.bf16.vlgmr.msra.gmra.mrb[0].mxu0 %vm53_vm1, %v29_v8  ;;  %212 = vmatpush1.bf16.msra.mxu1 %v543_v9  ;;  %v565_v26 = vld [vmem:[%s755_s5 + $0x8] sm:$0xff]   ;;  %v567_v28 = vld [vmem:[%s755_s5 + $0x10] sm:$0xff]   ;;  %v568_v29 = vld [vmem:[%s755_s5 + $0x58] sm:$0xff]   ;;  %v121_v51 = vsub.s32 0, %v120_v50  ;;  %v125_v53 = vsub.s32 1, %v120_v50 }
   0xa   :  { %213 = vmatprep.subr.bf16.mxu1 %v544_v10  ;;  %504 = vmatpush3.bf16.msra.mxu0 %v563_v24  ;;  %v569_v30 = vld [vmem:[%s755_s5 + $0x18] sm:$0xff]   ;;  %v570_v31 = vld [vmem:[%s755_s5 + $0x60] sm:$0xff]   ;;  %v572_v33 = vld [vmem:[%s755_s5 + $0x68] sm:$0xff]   ;;  %vm436_vm2 = vcmp.lt.s32.totalorder %v435_v6, 8 }
   0xb   :  { %505 = vmatprep.subr.bf16.mxu0 %v564_v25  ;;  %v571_v32 = vld [vmem:[%s755_s5 + $0x20] sm:$0xff]   ;;  %v573_v44 = vld [vmem:[%s755_s5 + $0x28] sm:$0xff]   ;;  %v574_v45 = vld [vmem:[%s755_s5 + $0x70] sm:$0xff]  }
   0xc   :  { %v463_v34 = vld [vmem:[%s756_s2] ss:$0 sm:$0xff]  ;;  %v575_v46 = vld [vmem:[%s755_s5 + $0x30] sm:$0xff]   ;;  %v576_v47 = vld [vmem:[%s755_s5 + $0x78] sm:$0xff]  }
   0xd   :  { %214 = vmatpush1.bf16.msra.mxu1 %v546_v11  ;;  %v577_v48 = vld [vmem:[%s755_s5 + $0x38] sm:$0xff]   ;;  %v117_v52 = vld [vmem:[%s757_s4] sm:$0x3] }
   0xe   :  { %215 = vmatprep.subr.bf16.mxu1 %v547_v12  ;;  %506 = vmatpush3.bf16.msra.mxu0 %v565_v26  ;;  %v122_v54 = vrot.slane %v117_v52, %v121_v51  ;;  %v126_v55 = vrot.slane %v117_v52, %v125_v53  ;;  %v483_v9 = vld [vmem:[%s758_s6] ss:$0 sm:$0xff] }
   0xf   :  { %507 = vmatprep.subr.bf16.mxu0 %v566_v27 }
  0x11   :  { %216 = vmatpush1.bf16.msra.mxu1 %v549_v13 }
  0x12   :  { %217 = vmatprep.subr.bf16.mxu1 %v550_v14  ;;  %508 = vmatpush3.bf16.msra.mxu0 %v567_v28 }
  0x13   :  { %509 = vmatprep.subr.bf16.mxu0 %v568_v29 }
  0x15   :  { %218 = vmatpush1.bf16.msra.mxu1 %v552_v15 }
  0x16   :  { %219 = vmatprep.subr.bf16.mxu1 %v553_v16  ;;  %510 = vmatpush3.bf16.msra.mxu0 %v569_v30 }
  0x17   :  { %511 = vmatprep.subr.bf16.mxu0 %v570_v31 }
  0x19   :  { %220 = vmatpush1.bf16.msra.mxu1 %v555_v17 }
  0x1a   :  { %221 = vmatprep.subr.bf16.mxu1 %v556_v18  ;;  %512 = vmatpush3.bf16.msra.mxu0 %v571_v32 }
  0x1b   :  { %513 = vmatprep.subr.bf16.mxu0 %v572_v33 }
  0x1d   :  { %222 = vmatpush1.bf16.msra.mxu1 %v558_v19 }
  0x1e   :  { %223 = vmatprep.subr.bf16.mxu1 %v559_v20  ;;  %514 = vmatpush3.bf16.msra.mxu0 %v573_v44 }
  0x1f   :  { %515 = vmatprep.subr.bf16.mxu0 %v574_v45 }
  0x21   :  { %224 = vmatpush1.bf16.msra.mxu1 %v561_v21 }
  0x22   :  { %516 = vmatpush3.bf16.msra.mxu0 %v575_v46 }
  0x23   :  { %517 = vmatprep.subr.bf16.mxu0 %v576_v47 }
  0x26   :  { %518 = vmatpush3.bf16.msra.mxu0 %v577_v48 }
  0xdc   :  { %v91_v35 = vpop.f32.mrb[0].mxu0 }
  0xdd   :  { %v92_v36 = vadd.f32 %v463_v34, %v91_v35  ;;  %v531_v37 = vpop.f32.mrb[1].mxu0 }
  0xde   :  { %v94_v38 = vpop.f32.mrb[2].mxu0 }
  0xdf   :  { %v95_v39 = vadd.f32 %v463_v34, %v94_v38  ;;  %v532_v40 = vpop.f32.mrb[3].mxu0  ;;  %v98_v41 = vmax.f32 %v92_v36, 0.0 }
  0xe1   :  { %v99_v42 = vmax.f32 %v95_v39, 0.0 }
  0xe3   :  { %v100_v43 = vpack.c.bf16 %v99_v42, %v98_v41 }
  0xe5   :  { %242 = vmatmul.mubr.bf16.vlgmr.msra.gmra.mrb[0].mxu1 %v100_v43 }
 0x1b8   :  { %v243_v56 = vpop.f32.mrb[0].mxu1 }
 0x1b9   :  { %v244_v57 = vadd.f32 %v243_v56, %v122_v54  ;;  %v245_v58 = vpop.f32.mrb[1].mxu1 }
 0x1ba   :  { %v246_v59 = vadd.f32 %v245_v58, %v126_v55  ;;  %v247_v60 = vpop.f32.mrb[2].mxu1 }
 0x1bb   :  { %v248_v61 = vadd.f32 %v247_v60, %v122_v54  ;;  %v249_v62 = vpop.f32.mrb[3].mxu1  ;;  %v252_v0 = vmax.f32 %v244_v57, 0.0 }
 0x1bc   :  { %v250_v63 = vadd.f32 %v249_v62, %v126_v55  ;;  %v253_v2 = vmax.f32 %v246_v59, 0.0 }
 0x1bd   :  { %v254_v1 = vmax.f32 %v248_v61, 0.0 }
 0x1be   :  { %v255_v3 = vmax.f32 %v250_v63, 0.0 }
 0x1bf   :  { %v256_v4 = vpack.c.bf16 %v254_v1, %v252_v0 }
 0x1c0   :  { %v257_v5 = vpack.c.bf16 %v255_v3, %v253_v2 }
 0x1c2   :  { %425 = vmatprep.mubr.bf16.mxu0 %v257_v5 }
 0x1c3   :  { %426 = vmatmul.mubr.bf16.vlgmr.msra.gmra.mrb[4].mxu0 %v256_v4 }
 0x296   :  { %v519_v7 = vpop.f32.mrb[4].mxu0 }
 0x297   :  { %v520_v8 = vpop.f32.mrb[5].mxu0 }
 0x298   :  { %v521_v10 = vadd.f32 %v520_v8, %v519_v7  ;;  %v522_v11 = vpop.f32.mrb[6].mxu0 }
 0x299   :  { %v523_v12 = vpop.f32.mrb[7].mxu0 }
 0x29a   :  { %v524_v13 = vadd.f32 %v523_v12, %v522_v11  ;;  %v428_v14 = vadd.f32 %v521_v10, %v483_v9 }
 0x29c   :  { %v437_v15 = vsel %vm436_vm2, %v428_v14, -inf  ;;  %v431_v16 = vadd.f32 %v524_v13, %v483_v9 }
 0x29d   :  { %439 = vmax.xlane.f32.xlu0 %v437_v15 }
 0x29e   :  { %v438_v17 = vsel %vm436_vm2, %v431_v16, -inf }
 0x2a1   :  { %441 = vmax.xlane.f32.xlu0 %v438_v17 }
 0x32a   :  { %v440_v18 = vpop.xlane.xlu0 %439 }
 0x32b   :  { %v443_v19 = vsub.f32 %v437_v15, %v440_v18 }
 0x32d   :  { %v445_v20 = vmul.f32 1.442695, %v443_v19 }
 0x32e   :  { %v442_v21 = vpop.xlane.xlu0 %441 }
 0x32f   :  { %578 = vpow2.f32 %v445_v20  ;;  %v444_v22 = vsub.f32 %v438_v17, %v442_v21 }
 0x331   :  { %v447_v23 = vmul.f32 1.442695, %v444_v22 }
 0x333   :  { %580 = vpow2.f32 %v447_v23 }
 0x339   :  { %v579_v24 = vpop.eup %578 }
 0x33a   :  { %449 = vadd.xlane.f32.xlu1 %v579_v24 }
 0x33d   :  { %v581_v25 = vpop.eup %580 }
 0x33e   :  { %451 = vadd.xlane.f32.xlu1 %v581_v25 }
 0x3c7   :  { %v450_v26 = vpop.xlane.xlu1 %449 }
 0x3c8   :  { %582 = vrcp.f32 %v450_v26 }
 0x3cb   :  { %v452_v27 = vpop.xlane.xlu1 %451 }
 0x3cc   :  { %584 = vrcp.f32 %v452_v27 }
 0x3d2   :  { %v583_v28 = vpop.eup %582 }
 0x3d3   :  { %v454_v29 = vmul.f32 %v583_v28, %v579_v24 }
 0x3d5   :  { %457 = vst [vmem:[%s759_s7] sm:$0xff] %v454_v29 }
 0x3d6   :  { %v585_v30 = vpop.eup %584 }
 0x3d7   :  { %v456_v31 = vmul.f32 %v585_v30, %v581_v25 }
 0x3d9   :  { %458 = vst [vmem:[%s759_s7 + $0x8] sm:$0xff] %v456_v31 }

</bundles_post_ra>
